<compile_context>
chip_gen: v7x
topology: tpu7x:2x2x1
jax: 0.10.0
libtpu: 0.0.40
codegen_flags: <defaults>
</compile_context>

<pallas_src>
import functools

import jax
import jax.numpy as jnp
import numpy as np
from jax.experimental import pallas as pl
from jax.experimental.pallas import tpu as pltpu

EPS = 1e-5  # PyTorch BatchNorm2d default


# --------------------------------------------------------------------------
# The single fused kernel (built by a factory so static config is baked in)
# --------------------------------------------------------------------------
def _make_encoder_kernel(n_layers, n_taps, m):
    inv_m = 1.0 / m  # true M (no lane padding at these sizes)

    def _bn(y, g, b):
        # BN folded to per-channel scale/shift; one-pass sum / sum-of-squares.
        s1 = jnp.sum(y, axis=1, keepdims=True) * inv_m
        s2 = jnp.sum(y * y, axis=1, keepdims=True) * inv_m
        var = jnp.maximum(s2 - s1 * s1, 0.0)
        scale = g * jax.lax.rsqrt(var + EPS)          # rsqrt -> EUP slot (free)
        return y * scale + (b - s1 * scale)

    def kernel(*refs):
        (p0_ref, w0_ref, xs_ref, wp_ref,
         g0_ref, b0_ref, gs_ref, bs_ref,
         w_ref, s_ref, g_ref, b_ref) = refs[:12]
        out_refs = refs[12:]

        # ---- layer 0: strided conv (im2col matmul) + BN,
        #      1x1 strided projection shortcut + BN, residual add, ReLU.
        y0 = jnp.dot(w0_ref[...], p0_ref[...], preferred_element_type=jnp.float32)
        sk = jnp.dot(wp_ref[...], xs_ref[...], preferred_element_type=jnp.float32)
        act = jnp.maximum(
            _bn(y0, g0_ref[...], b0_ref[...]) + _bn(sk, gs_ref[...], bs_ref[...]),
            0.0)
        out_refs[0][...] = act

        # ---- layers 1..L-1: 3x3 stride-1 conv entirely in VMEM.
        # tap_t = act @ S_t  (exact permuted copy / zero-padded columns),
        # y    += W_t @ tap_t, identity residual, BN, ReLU.
        for l in range(n_layers - 1):
            a_bf = act.astype(jnp.bfloat16)           # cast once, only for the MXU
            y = jnp.zeros_like(act)
            for t in range(n_taps):
                shifted = jnp.dot(a_bf, s_ref[t],
                                  preferred_element_type=jnp.float32)
                # shifted is an exact copy of bf16 values -> lossless re-cast.
                y = y + jnp.dot(w_ref[l * n_taps + t],
                                shifted.astype(jnp.bfloat16),
                                preferred_element_type=jnp.float32)
            act = jnp.maximum(_bn(y, g_ref[l], b_ref[l]) + act, 0.0)
            out_refs[l + 1][...] = act

    return kernel


def _vmem_spec():
    return pl.BlockSpec(memory_space=pltpu.MemorySpace.VMEM)


# --------------------------------------------------------------------------
# Plain-JAX / numpy glue (tiny, one-shot, on the external input only)
# --------------------------------------------------------------------------
def im2col_t(x_cnhw, kh, kw, stride, pad):
    """x: (C, N, H, W) -> patches^T (kh*kw*C, N*Ho*Wo), plus (N, Ho, Wo)."""
    C, N, H, W = x_cnhw.shape
    xp = jnp.pad(x_cnhw, ((0, 0), (0, 0), (pad, pad), (pad, pad)))
    Ho = (H + 2 * pad - kh) // stride + 1
    Wo = (W + 2 * pad - kw) // stride + 1
    taps = []
    for i in range(kh):
        for j in range(kw):
            taps.append(
                xp[:, :, i:i + stride * Ho:stride, j:j + stride * Wo:stride])
    patches = jnp.stack(taps, axis=0)                      # (kh*kw, C, N, Ho, Wo)
    return patches.reshape(kh * kw * C, N * Ho * Wo), (N, Ho, Wo)


def _pad_rows(a, mult=16):
    r = (-a.shape[0]) % mult
    return a if r == 0 else jnp.pad(a, ((0, r), (0, 0)))


def _pad_cols(a, mult=16):
    r = (-a.shape[1]) % mult
    return a if r == 0 else jnp.pad(a, ((0, 0), (0, r)))


def _shift_matrices(n, h, w, k, pad):
    """0/1 matrices S_t (M, M): (a @ S_t)[:, m] = a[:, src_t(m)], 0 if padded."""
    m = n * h * w
    idx = np.arange(m)
    nn, ho, wo = idx // (h * w), (idx // w) % h, idx % w
    s = np.zeros((k * k, m, m), np.float32)
    for di in range(k):
        for dj in range(k):
            hi, wi = ho + di - pad, wo + dj - pad
            valid = (hi >= 0) & (hi < h) & (wi >= 0) & (wi < w)
            src = (nn * h + np.clip(hi, 0, h - 1)) * w + np.clip(wi, 0, w - 1)
            s[di * k + dj, src[valid], idx[valid]] = 1.0
    return s


def init_encoder_params(key, in_c, features, n_layers, kernel):
    """PyTorch-layout params (conv biases omitted: batch-stat BN cancels them)."""
    params = []
    for i in range(n_layers):
        cin = in_c if i == 0 else features
        key, k1, k2, k3, k4, k5, k6 = jax.random.split(key, 7)
        layer = {
            "w": jax.random.normal(k1, (features, cin, kernel, kernel),
                                   jnp.float32) * 0.1,
            "gamma": 1.0 + 0.1 * jax.random.normal(k3, (features,), jnp.float32),
            "beta": 0.1 * jax.random.normal(k4, (features,), jnp.float32),
        }
        if i == 0:
            layer["w_proj"] = jax.random.normal(
                k2, (features, cin, 1, 1), jnp.float32) * 0.1
            layer["gamma_sc"] = 1.0 + 0.1 * jax.random.normal(
                k5, (features,), jnp.float32)
            layer["beta_sc"] = 0.1 * jax.random.normal(k6, (features,), jnp.float32)
        params.append(layer)
    return params


def encoder_block_forward(x_nchw, params, kernel=3):
    """Mirrors EncoderBlock.forward: returns (out, activations) in NCHW."""
    K = kernel
    pad = (K - 1) // 2
    n_layers = len(params)
    F = params[0]["w"].shape[0]
    N, Cin, H, W = x_nchw.shape

    # channels-major (C, N, H, W): flattened spatial goes to the lane axis.
    x_t = jnp.transpose(x_nchw, (1, 0, 2, 3)).astype(jnp.float32)

    # Layer-0 im2col (stride 2) on the *external* input — tiny, one-shot XLA.
    # TODO(synk): at realistic sizes move this in-kernel as well.
    p0, (_, Ho, Wo) = im2col_t(x_t, K, K, 2, pad)
    M = N * Ho * Wo
    p0 = _pad_rows(p0.astype(jnp.bfloat16))
    w0 = _pad_cols(jnp.transpose(params[0]["w"], (0, 2, 3, 1))
                   .reshape(F, K * K * Cin).astype(jnp.bfloat16))
    xs = _pad_rows(x_t[:, :, ::2, ::2].reshape(Cin, M).astype(jnp.bfloat16))
    wp = _pad_cols(params[0]["w_proj"].reshape(F, Cin).astype(jnp.bfloat16))

    # Layers >= 1: per-tap weights and constant in-VMEM shift matrices.
    S = jnp.asarray(_shift_matrices(N, Ho, Wo, K, pad), jnp.bfloat16)  # (K*K, M, M)
    rest = params[1:]
    if rest:
        w_rest = jnp.concatenate(
            [jnp.transpose(p["w"], (2, 3, 0, 1)).reshape(K * K, F, F) for p in rest],
            axis=0).astype(jnp.bfloat16)                     # ((L-1)*K*K, F, F)
        g_rest = jnp.stack([p["gamma"].reshape(F, 1) for p in rest]).astype(jnp.float32)
        b_rest = jnp.stack([p["beta"].reshape(F, 1) for p in rest]).astype(jnp.float32)
    else:  # n_layers == 1: unused dummies keep the kernel arity fixed
        w_rest = jnp.zeros((K * K, F, F), jnp.bfloat16)
        g_rest = jnp.zeros((1, F, 1), jnp.float32)
        b_rest = jnp.zeros((1, F, 1), jnp.float32)

    col = lambda v: v.reshape(F, 1).astype(jnp.float32)
    l0 = params[0]
    inputs = [p0, w0, xs, wp,
              col(l0["gamma"]), col(l0["beta"]),
              col(l0["gamma_sc"]), col(l0["beta_sc"]),
              w_rest, S, g_rest, b_rest]

    # Single fused launch, no grid: whole working set ~0.4 MiB of VMEM.
    # TODO(synk): for large M add an M grid axis (parallel for v7x's 2 TCs)
    # with cross-tile BN accumulation and explicit vmem_limit_bytes sizing.
    acts_t = pl.pallas_call(
        _make_encoder_kernel(n_layers, K * K, M),
        out_shape=tuple(jax.ShapeDtypeStruct((F, M), jnp.float32)
                        for _ in range(n_layers)),
        in_specs=[_vmem_spec()] * len(inputs),
        out_specs=tuple(_vmem_spec() for _ in range(n_layers)),
    )(*inputs)

    # Layout restored only once per returned activation (module returns NCHW).
    activations = [jnp.transpose(a.reshape(F, N, Ho, Wo), (1, 0, 2, 3))
                   for a in acts_t]
    return activations[-1], activations


# --------------------------------------------------------------------------
# Independent reference: lax.conv + f32 BN/ReLU (same bf16 MXU operand casts)
# --------------------------------------------------------------------------
def _bn_ref(y, gamma, beta):
    mean = jnp.mean(y, axis=(0, 2, 3), keepdims=True)
    var = jnp.mean(jnp.square(y - mean), axis=(0, 2, 3), keepdims=True)
    return ((y - mean) * jax.lax.rsqrt(var + EPS) * gamma.reshape(1, -1, 1, 1)
            + beta.reshape(1, -1, 1, 1))


def encoder_block_reference(x, params, kernel=3):
    pad = (kernel - 1) // 2
    out = x.astype(jnp.float32)
    acts = []
    for i, layer in enumerate(params):
        stride = 2 if i == 0 else 1
        y = jax.lax.conv_general_dilated(
            out.astype(jnp.bfloat16), layer["w"].astype(jnp.bfloat16),
            window_strides=(stride, stride), padding=[(pad, pad), (pad, pad)],
            dimension_numbers=("NCHW", "OIHW", "NCHW"),
            preferred_element_type=jnp.float32)
        main = _bn_ref(y, layer["gamma"], layer["beta"])
        if i == 0:
            sk = jax.lax.conv_general_dilated(
                out.astype(jnp.bfloat16), layer["w_proj"].astype(jnp.bfloat16),
                window_strides=(stride, stride), padding=[(0, 0), (0, 0)],
                dimension_numbers=("NCHW", "OIHW", "NCHW"),
                preferred_element_type=jnp.float32)
            sk = _bn_ref(sk, layer["gamma_sc"], layer["beta_sc"])
        else:
            sk = out
        out = jnp.maximum(main + sk, 0.0)
        acts.append(out)
    return out, acts


# --------------------------------------------------------------------------
if __name__ == "__main__":
    # EncoderBlock(in_c=4, features=8, n_layers=2, kernel=3, activation=ReLU)
    in_c, features, n_layers, kernel = 4, 8, 2, 3
    batch, spatial = 2, 16

    key = jax.random.PRNGKey(0)
    key, kx = jax.random.split(key)
    x = jax.random.normal(kx, (batch, in_c, spatial, spatial), jnp.float32)
    params = init_encoder_params(key, in_c, features, n_layers, kernel)

    fwd = jax.jit(functools.partial(encoder_block_forward, kernel=kernel))
    out, activations = fwd(x, params)
    out = jax.block_until_ready(out)
    activations = [jax.block_until_ready(a) for a in activations]

    assert out.shape == (batch, features, spatial // 2, spatial // 2), out.shape
    assert len(activations) == n_layers
    for a in activations:
        assert a.shape == (batch, features, spatial // 2, spatial // 2), a.shape
    assert jnp.all(jnp.isfinite(out))

    ref_fn = jax.jit(functools.partial(encoder_block_reference, kernel=kernel))
    ref_out, ref_acts = ref_fn(x, params)
    ref_out = jax.block_until_ready(ref_out)
    for got, want in zip(activations, ref_acts):
        err = float(jnp.max(jnp.abs(got - want)))
        assert jnp.allclose(got, want, atol=2e-2, rtol=2e-2), f"mismatch: {err}"

    print("KERNEL_OK")
</pallas_src>

<mosaic_0001>
module attributes {stable_mosaic.version = 11 : i64} {
  func.func @kernel(%arg0: memref<48x128xbf16, #tpu.memory_space<vmem>>, %arg1: memref<8x48xbf16, #tpu.memory_space<vmem>>, %arg2: memref<16x128xbf16, #tpu.memory_space<vmem>>, %arg3: memref<8x16xbf16, #tpu.memory_space<vmem>>, %arg4: memref<8x1xf32, #tpu.memory_space<vmem>>, %arg5: memref<8x1xf32, #tpu.memory_space<vmem>>, %arg6: memref<8x1xf32, #tpu.memory_space<vmem>>, %arg7: memref<8x1xf32, #tpu.memory_space<vmem>>, %arg8: memref<9x8x8xbf16, #tpu.memory_space<vmem>>, %arg9: memref<9x128x128xbf16, #tpu.memory_space<vmem>>, %arg10: memref<1x8x1xf32, #tpu.memory_space<vmem>>, %arg11: memref<1x8x1xf32, #tpu.memory_space<vmem>>, %arg12: memref<8x128xf32, #tpu.memory_space<vmem>>, %arg13: memref<8x128xf32, #tpu.memory_space<vmem>>) attributes {dimension_semantics = [], scalar_prefetch = 0 : i64, scratch_operands = 0 : i64, tpu.core_type = #tpu.core_type<tc>} {
    %c0 = arith.constant 0 : index
    %c0_0 = arith.constant 0 : index
    %0 = vector.load %arg1[%c0, %c0_0] : memref<8x48xbf16, #tpu.memory_space<vmem>>, vector<8x48xbf16>
    %c0_1 = arith.constant 0 : index
    %c0_2 = arith.constant 0 : index
    %1 = vector.load %arg0[%c0_1, %c0_2] : memref<48x128xbf16, #tpu.memory_space<vmem>>, vector<48x128xbf16>
    %cst = arith.constant dense<0.000000e+00> : vector<8x128xf32>
    %2 = tpu.matmul %0, %1, %cst {dimension_numbers = #tpu.dot_dimension_numbers<[1], [0], [0], [1], [0, 0, 1, 1], [], []>} : vector<8x48xbf16>, vector<48x128xbf16>, vector<8x128xf32> -> vector<8x128xf32>
    %c0_3 = arith.constant 0 : index
    %c0_4 = arith.constant 0 : index
    %3 = vector.load %arg3[%c0_3, %c0_4] : memref<8x16xbf16, #tpu.memory_space<vmem>>, vector<8x16xbf16>
    %c0_5 = arith.constant 0 : index
    %c0_6 = arith.constant 0 : index
    %4 = vector.load %arg2[%c0_5, %c0_6] : memref<16x128xbf16, #tpu.memory_space<vmem>>, vector<16x128xbf16>
    %cst_7 = arith.constant dense<0.000000e+00> : vector<8x128xf32>
    %5 = tpu.matmul %3, %4, %cst_7 {dimension_numbers = #tpu.dot_dimension_numbers<[1], [0], [0], [1], [0, 0, 1, 1], [], []>} : vector<8x16xbf16>, vector<16x128xbf16>, vector<8x128xf32> -> vector<8x128xf32>
    %c0_8 = arith.constant 0 : index
    %c0_9 = arith.constant 0 : index
    %6 = vector.load %arg4[%c0_8, %c0_9] : memref<8x1xf32, #tpu.memory_space<vmem>>, vector<8x1xf32>
    %c0_10 = arith.constant 0 : index
    %c0_11 = arith.constant 0 : index
    %7 = vector.load %arg5[%c0_10, %c0_11] : memref<8x1xf32, #tpu.memory_space<vmem>>, vector<8x1xf32>
    %cst_12 = arith.constant dense<0.000000e+00> : vector<8xf32>
    %8 = vector.multi_reduction <add>, %2, %cst_12 [1] : vector<8x128xf32> to vector<8xf32>
    %9 = vector.shape_cast %8 : vector<8xf32> to vector<8x1xf32>
    %cst_13 = arith.constant 7.812500e-03 : f32
    %10 = vector.broadcast %cst_13 : f32 to vector<8x1xf32>
    %11 = arith.mulf %9, %10 : vector<8x1xf32>
    %12 = arith.mulf %2, %2 : vector<8x128xf32>
    %cst_14 = arith.constant dense<0.000000e+00> : vector<8xf32>
    %13 = vector.multi_reduction <add>, %12, %cst_14 [1] : vector<8x128xf32> to vector<8xf32>
    %14 = vector.shape_cast %13 : vector<8xf32> to vector<8x1xf32>
    %cst_15 = arith.constant 7.812500e-03 : f32
    %15 = vector.broadcast %cst_15 : f32 to vector<8x1xf32>
    %16 = arith.mulf %14, %15 : vector<8x1xf32>
    %17 = arith.mulf %11, %11 : vector<8x1xf32>
    %18 = arith.subf %16, %17 : vector<8x1xf32>
    %cst_16 = arith.constant 0.000000e+00 : f32
    %19 = vector.broadcast %cst_16 : f32 to vector<8x1xf32>
    %20 = arith.maximumf %18, %19 : vector<8x1xf32>
    %cst_17 = arith.constant 9.99999974E-6 : f32
    %21 = vector.broadcast %cst_17 : f32 to vector<8x1xf32>
    %22 = arith.addf %20, %21 : vector<8x1xf32>
    %23 = math.rsqrt %22 : vector<8x1xf32>
    %24 = arith.mulf %6, %23 : vector<8x1xf32>
    %25 = vector.broadcast %24 : vector<8x1xf32> to vector<8x128xf32>
    %26 = arith.mulf %2, %25 : vector<8x128xf32>
    %27 = arith.mulf %11, %24 : vector<8x1xf32>
    %28 = arith.subf %7, %27 : vector<8x1xf32>
    %29 = vector.broadcast %28 : vector<8x1xf32> to vector<8x128xf32>
    %30 = arith.addf %26, %29 : vector<8x128xf32>
    %c0_18 = arith.constant 0 : index
    %c0_19 = arith.constant 0 : index
    %31 = vector.load %arg6[%c0_18, %c0_19] : memref<8x1xf32, #tpu.memory_space<vmem>>, vector<8x1xf32>
    %c0_20 = arith.constant 0 : index
    %c0_21 = arith.constant 0 : index
    %32 = vector.load %arg7[%c0_20, %c0_21] : memref<8x1xf32, #tpu.memory_space<vmem>>, vector<8x1xf32>
    %cst_22 = arith.constant dense<0.000000e+00> : vector<8xf32>
    %33 = vector.multi_reduction <add>, %5, %cst_22 [1] : vector<8x128xf32> to vector<8xf32>
    %34 = vector.shape_cast %33 : vector<8xf32> to vector<8x1xf32>
    %cst_23 = arith.constant 7.812500e-03 : f32
    %35 = vector.broadcast %cst_23 : f32 to vector<8x1xf32>
    %36 = arith.mulf %34, %35 : vector<8x1xf32>
    %37 = arith.mulf %5, %5 : vector<8x128xf32>
    %cst_24 = arith.constant dense<0.000000e+00> : vector<8xf32>
    %38 = vector.multi_reduction <add>, %37, %cst_24 [1] : vector<8x128xf32> to vector<8xf32>
    %39 = vector.shape_cast %38 : vector<8xf32> to vector<8x1xf32>
    %cst_25 = arith.constant 7.812500e-03 : f32
    %40 = vector.broadcast %cst_25 : f32 to vector<8x1xf32>
    %41 = arith.mulf %39, %40 : vector<8x1xf32>
    %42 = arith.mulf %36, %36 : vector<8x1xf32>
    %43 = arith.subf %41, %42 : vector<8x1xf32>
    %cst_26 = arith.constant 0.000000e+00 : f32
    %44 = vector.broadcast %cst_26 : f32 to vector<8x1xf32>
    %45 = arith.maximumf %43, %44 : vector<8x1xf32>
    %cst_27 = arith.constant 9.99999974E-6 : f32
    %46 = vector.broadcast %cst_27 : f32 to vector<8x1xf32>
    %47 = arith.addf %45, %46 : vector<8x1xf32>
    %48 = math.rsqrt %47 : vector<8x1xf32>
    %49 = arith.mulf %31, %48 : vector<8x1xf32>
    %50 = vector.broadcast %49 : vector<8x1xf32> to vector<8x128xf32>
    %51 = arith.mulf %5, %50 : vector<8x128xf32>
    %52 = arith.mulf %36, %49 : vector<8x1xf32>
    %53 = arith.subf %32, %52 : vector<8x1xf32>
    %54 = vector.broadcast %53 : vector<8x1xf32> to vector<8x128xf32>
    %55 = arith.addf %51, %54 : vector<8x128xf32>
    %56 = arith.addf %30, %55 : vector<8x128xf32>
    %cst_28 = arith.constant 0.000000e+00 : f32
    %57 = vector.broadcast %cst_28 : f32 to vector<8x128xf32>
    %58 = arith.maximumf %56, %57 : vector<8x128xf32>
    %c0_29 = arith.constant 0 : index
    %c0_30 = arith.constant 0 : index
    %59 = vector.load %arg12[%c0_29, %c0_30] : memref<8x128xf32, #tpu.memory_space<vmem>>, vector<8x128xf32>
    tpu.vector_store %arg12[%c0_29, %c0_30], %58 {strides = array<i32>} : memref<8x128xf32, #tpu.memory_space<vmem>>, vector<8x128xf32>,
    %60 = arith.truncf %58 : vector<8x128xf32> to vector<8x128xbf16>
    %cst_31 = arith.constant 0.000000e+00 : f32
    %61 = vector.broadcast %cst_31 : f32 to vector<8x128xf32>
    %c0_32 = arith.constant 0 : index
    %c0_33 = arith.constant 0 : index
    %c0_34 = arith.constant 0 : index
    %62 = vector.load %arg9[%c0_32, %c0_33, %c0_34] : memref<9x128x128xbf16, #tpu.memory_space<vmem>>, vector<1x128x128xbf16>
    %63 = vector.shape_cast %62 : vector<1x128x128xbf16> to vector<128x128xbf16>
    %cst_35 = arith.constant dense<0.000000e+00> : vector<8x128xf32>
    %64 = tpu.matmul %60, %63, %cst_35 {dimension_numbers = #tpu.dot_dimension_numbers<[1], [0], [0], [1], [0, 0, 1, 1], [], []>} : vector<8x128xbf16>, vector<128x128xbf16>, vector<8x128xf32> -> vector<8x128xf32>
    %c0_36 = arith.constant 0 : index
    %c0_37 = arith.constant 0 : index
    %c0_38 = arith.constant 0 : index
    %65 = vector.load %arg8[%c0_36, %c0_37, %c0_38] : memref<9x8x8xbf16, #tpu.memory_space<vmem>>, vector<1x8x8xbf16>
    %66 = vector.shape_cast %65 : vector<1x8x8xbf16> to vector<8x8xbf16>
    %67 = arith.truncf %64 : vector<8x128xf32> to vector<8x128xbf16>
    %cst_39 = arith.constant dense<0.000000e+00> : vector<8x128xf32>
    %68 = tpu.matmul %66, %67, %cst_39 {dimension_numbers = #tpu.dot_dimension_numbers<[1], [0], [0], [1], [0, 0, 1, 1], [], []>} : vector<8x8xbf16>, vector<8x128xbf16>, vector<8x128xf32> -> vector<8x128xf32>
    %69 = arith.addf %61, %68 : vector<8x128xf32>
    %c1 = arith.constant 1 : index
    %c0_40 = arith.constant 0 : index
    %c0_41 = arith.constant 0 : index
    %70 = vector.load %arg9[%c1, %c0_40, %c0_41] : memref<9x128x128xbf16, #tpu.memory_space<vmem>>, vector<1x128x128xbf16>
    %71 = vector.shape_cast %70 : vector<1x128x128xbf16> to vector<128x128xbf16>
    %cst_42 = arith.constant dense<0.000000e+00> : vector<8x128xf32>
    %72 = tpu.matmul %60, %71, %cst_42 {dimension_numbers = #tpu.dot_dimension_numbers<[1], [0], [0], [1], [0, 0, 1, 1], [], []>} : vector<8x128xbf16>, vector<128x128xbf16>, vector<8x128xf32> -> vector<8x128xf32>
    %c1_43 = arith.constant 1 : index
    %c0_44 = arith.constant 0 : index
    %c0_45 = arith.constant 0 : index
    %73 = vector.load %arg8[%c1_43, %c0_44, %c0_45] : memref<9x8x8xbf16, #tpu.memory_space<vmem>>, vector<1x8x8xbf16>
    %74 = vector.shape_cast %73 : vector<1x8x8xbf16> to vector<8x8xbf16>
    %75 = arith.truncf %72 : vector<8x128xf32> to vector<8x128xbf16>
    %cst_46 = arith.constant dense<0.000000e+00> : vector<8x128xf32>
    %76 = tpu.matmul %74, %75, %cst_46 {dimension_numbers = #tpu.dot_dimension_numbers<[1], [0], [0], [1], [0, 0, 1, 1], [], []>} : vector<8x8xbf16>, vector<8x128xbf16>, vector<8x128xf32> -> vector<8x128xf32>
    %77 = arith.addf %69, %76 : vector<8x128xf32>
    %c2 = arith.constant 2 : index
    %c0_47 = arith.constant 0 : index
    %c0_48 = arith.constant 0 : index
    %78 = vector.load %arg9[%c2, %c0_47, %c0_48] : memref<9x128x128xbf16, #tpu.memory_space<vmem>>, vector<1x128x128xbf16>
    %79 = vector.shape_cast %78 : vector<1x128x128xbf16> to vector<128x128xbf16>
    %cst_49 = arith.constant dense<0.000000e+00> : vector<8x128xf32>
    %80 = tpu.matmul %60, %79, %cst_49 {dimension_numbers = #tpu.dot_dimension_numbers<[1], [0], [0], [1], [0, 0, 1, 1], [], []>} : vector<8x128xbf16>, vector<128x128xbf16>, vector<8x128xf32> -> vector<8x128xf32>
    %c2_50 = arith.constant 2 : index
    %c0_51 = arith.constant 0 : index
    %c0_52 = arith.constant 0 : index
    %81 = vector.load %arg8[%c2_50, %c0_51, %c0_52] : memref<9x8x8xbf16, #tpu.memory_space<vmem>>, vector<1x8x8xbf16>
    %82 = vector.shape_cast %81 : vector<1x8x8xbf16> to vector<8x8xbf16>
    %83 = arith.truncf %80 : vector<8x128xf32> to vector<8x128xbf16>
    %cst_53 = arith.constant dense<0.000000e+00> : vector<8x128xf32>
    %84 = tpu.matmul %82, %83, %cst_53 {dimension_numbers = #tpu.dot_dimension_numbers<[1], [0], [0], [1], [0, 0, 1, 1], [], []>} : vector<8x8xbf16>, vector<8x128xbf16>, vector<8x128xf32> -> vector<8x128xf32>
    %85 = arith.addf %77, %84 : vector<8x128xf32>
    %c3 = arith.constant 3 : index
    %c0_54 = arith.constant 0 : index
    %c0_55 = arith.constant 0 : index
    %86 = vector.load %arg9[%c3, %c0_54, %c0_55] : memref<9x128x128xbf16, #tpu.memory_space<vmem>>, vector<1x128x128xbf16>
    %87 = vector.shape_cast %86 : vector<1x128x128xbf16> to vector<128x128xbf16>
    %cst_56 = arith.constant dense<0.000000e+00> : vector<8x128xf32>
    %88 = tpu.matmul %60, %87, %cst_56 {dimension_numbers = #tpu.dot_dimension_numbers<[1], [0], [0], [1], [0, 0, 1, 1], [], []>} : vector<8x128xbf16>, vector<128x128xbf16>, vector<8x128xf32> -> vector<8x128xf32>
    %c3_57 = arith.constant 3 : index
    %c0_58 = arith.constant 0 : index
    %c0_59 = arith.constant 0 : index
    %89 = vector.load %arg8[%c3_57, %c0_58, %c0_59] : memref<9x8x8xbf16, #tpu.memory_space<vmem>>, vector<1x8x8xbf16>
    %90 = vector.shape_cast %89 : vector<1x8x8xbf16> to vector<8x8xbf16>
    %91 = arith.truncf %88 : vector<8x128xf32> to vector<8x128xbf16>
    %cst_60 = arith.constant dense<0.000000e+00> : vector<8x128xf32>
    %92 = tpu.matmul %90, %91, %cst_60 {dimension_numbers = #tpu.dot_dimension_numbers<[1], [0], [0], [1], [0, 0, 1, 1], [], []>} : vector<8x8xbf16>, vector<8x128xbf16>, vector<8x128xf32> -> vector<8x128xf32>
    %93 = arith.addf %85, %92 : vector<8x128xf32>
    %c4 = arith.constant 4 : index
    %c0_61 = arith.constant 0 : index
    %c0_62 = arith.constant 0 : index
    %94 = vector.load %arg9[%c4, %c0_61, %c0_62] : memref<9x128x128xbf16, #tpu.memory_space<vmem>>, vector<1x128x128xbf16>
    %95 = vector.shape_cast %94 : vector<1x128x128xbf16> to vector<128x128xbf16>
    %cst_63 = arith.constant dense<0.000000e+00> : vector<8x128xf32>
    %96 = tpu.matmul %60, %95, %cst_63 {dimension_numbers = #tpu.dot_dimension_numbers<[1], [0], [0], [1], [0, 0, 1, 1], [], []>} : vector<8x128xbf16>, vector<128x128xbf16>, vector<8x128xf32> -> vector<8x128xf32>
    %c4_64 = arith.constant 4 : index
    %c0_65 = arith.constant 0 : index
    %c0_66 = arith.constant 0 : index
    %97 = vector.load %arg8[%c4_64, %c0_65, %c0_66] : memref<9x8x8xbf16, #tpu.memory_space<vmem>>, vector<1x8x8xbf16>
    %98 = vector.shape_cast %97 : vector<1x8x8xbf16> to vector<8x8xbf16>
    %99 = arith.truncf %96 : vector<8x128xf32> to vector<8x128xbf16>
    %cst_67 = arith.constant dense<0.000000e+00> : vector<8x128xf32>
    %100 = tpu.matmul %98, %99, %cst_67 {dimension_numbers = #tpu.dot_dimension_numbers<[1], [0], [0], [1], [0, 0, 1, 1], [], []>} : vector<8x8xbf16>, vector<8x128xbf16>, vector<8x128xf32> -> vector<8x128xf32>
    %101 = arith.addf %93, %100 : vector<8x128xf32>
    %c5 = arith.constant 5 : index
    %c0_68 = arith.constant 0 : index
    %c0_69 = arith.constant 0 : index
    %102 = vector.load %arg9[%c5, %c0_68, %c0_69] : memref<9x128x128xbf16, #tpu.memory_space<vmem>>, vector<1x128x128xbf16>
    %103 = vector.shape_cast %102 : vector<1x128x128xbf16> to vector<128x128xbf16>
    %cst_70 = arith.constant dense<0.000000e+00> : vector<8x128xf32>
    %104 = tpu.matmul %60, %103, %cst_70 {dimension_numbers = #tpu.dot_dimension_numbers<[1], [0], [0], [1], [0, 0, 1, 1], [], []>} : vector<8x128xbf16>, vector<128x128xbf16>, vector<8x128xf32> -> vector<8x128xf32>
    %c5_71 = arith.constant 5 : index
    %c0_72 = arith.constant 0 : index
    %c0_73 = arith.constant 0 : index
    %105 = vector.load %arg8[%c5_71, %c0_72, %c0_73] : memref<9x8x8xbf16, #tpu.memory_space<vmem>>, vector<1x8x8xbf16>
    %106 = vector.shape_cast %105 : vector<1x8x8xbf16> to vector<8x8xbf16>
    %107 = arith.truncf %104 : vector<8x128xf32> to vector<8x128xbf16>
    %cst_74 = arith.constant dense<0.000000e+00> : vector<8x128xf32>
    %108 = tpu.matmul %106, %107, %cst_74 {dimension_numbers = #tpu.dot_dimension_numbers<[1], [0], [0], [1], [0, 0, 1, 1], [], []>} : vector<8x8xbf16>, vector<8x128xbf16>, vector<8x128xf32> -> vector<8x128xf32>
    %109 = arith.addf %101, %108 : vector<8x128xf32>
    %c6 = arith.constant 6 : index
    %c0_75 = arith.constant 0 : index
    %c0_76 = arith.constant 0 : index
    %110 = vector.load %arg9[%c6, %c0_75, %c0_76] : memref<9x128x128xbf16, #tpu.memory_space<vmem>>, vector<1x128x128xbf16>
    %111 = vector.shape_cast %110 : vector<1x128x128xbf16> to vector<128x128xbf16>
    %cst_77 = arith.constant dense<0.000000e+00> : vector<8x128xf32>
    %112 = tpu.matmul %60, %111, %cst_77 {dimension_numbers = #tpu.dot_dimension_numbers<[1], [0], [0], [1], [0, 0, 1, 1], [], []>} : vector<8x128xbf16>, vector<128x128xbf16>, vector<8x128xf32> -> vector<8x128xf32>
    %c6_78 = arith.constant 6 : index
    %c0_79 = arith.constant 0 : index
    %c0_80 = arith.constant 0 : index
    %113 = vector.load %arg8[%c6_78, %c0_79, %c0_80] : memref<9x8x8xbf16, #tpu.memory_space<vmem>>, vector<1x8x8xbf16>
    %114 = vector.shape_cast %113 : vector<1x8x8xbf16> to vector<8x8xbf16>
    %115 = arith.truncf %112 : vector<8x128xf32> to vector<8x128xbf16>
    %cst_81 = arith.constant dense<0.000000e+00> : vector<8x128xf32>
    %116 = tpu.matmul %114, %115, %cst_81 {dimension_numbers = #tpu.dot_dimension_numbers<[1], [0], [0], [1], [0, 0, 1, 1], [], []>} : vector<8x8xbf16>, vector<8x128xbf16>, vector<8x128xf32> -> vector<8x128xf32>
    %117 = arith.addf %109, %116 : vector<8x128xf32>
    %c7 = arith.constant 7 : index
    %c0_82 = arith.constant 0 : index
    %c0_83 = arith.constant 0 : index
    %118 = vector.load %arg9[%c7, %c0_82, %c0_83] : memref<9x128x128xbf16, #tpu.memory_space<vmem>>, vector<1x128x128xbf16>
    %119 = vector.shape_cast %118 : vector<1x128x128xbf16> to vector<128x128xbf16>
    %cst_84 = arith.constant dense<0.000000e+00> : vector<8x128xf32>
    %120 = tpu.matmul %60, %119, %cst_84 {dimension_numbers = #tpu.dot_dimension_numbers<[1], [0], [0], [1], [0, 0, 1, 1], [], []>} : vector<8x128xbf16>, vector<128x128xbf16>, vector<8x128xf32> -> vector<8x128xf32>
    %c7_85 = arith.constant 7 : index
    %c0_86 = arith.constant 0 : index
    %c0_87 = arith.constant 0 : index
    %121 = vector.load %arg8[%c7_85, %c0_86, %c0_87] : memref<9x8x8xbf16, #tpu.memory_space<vmem>>, vector<1x8x8xbf16>
    %122 = vector.shape_cast %121 : vector<1x8x8xbf16> to vector<8x8xbf16>
    %123 = arith.truncf %120 : vector<8x128xf32> to vector<8x128xbf16>
    %cst_88 = arith.constant dense<0.000000e+00> : vector<8x128xf32>
    %124 = tpu.matmul %122, %123, %cst_88 {dimension_numbers = #tpu.dot_dimension_numbers<[1], [0], [0], [1], [0, 0, 1, 1], [], []>} : vector<8x8xbf16>, vector<8x128xbf16>, vector<8x128xf32> -> vector<8x128xf32>
    %125 = arith.addf %117, %124 : vector<8x128xf32>
    %c8 = arith.constant 8 : index
    %c0_89 = arith.constant 0 : index
    %c0_90 = arith.constant 0 : index
    %126 = vector.load %arg9[%c8, %c0_89, %c0_90] : memref<9x128x128xbf16, #tpu.memory_space<vmem>>, vector<1x128x128xbf16>
    %127 = vector.shape_cast %126 : vector<1x128x128xbf16> to vector<128x128xbf16>
    %cst_91 = arith.constant dense<0.000000e+00> : vector<8x128xf32>
    %128 = tpu.matmul %60, %127, %cst_91 {dimension_numbers = #tpu.dot_dimension_numbers<[1], [0], [0], [1], [0, 0, 1, 1], [], []>} : vector<8x128xbf16>, vector<128x128xbf16>, vector<8x128xf32> -> vector<8x128xf32>
    %c8_92 = arith.constant 8 : index
    %c0_93 = arith.constant 0 : index
    %c0_94 = arith.constant 0 : index
    %129 = vector.load %arg8[%c8_92, %c0_93, %c0_94] : memref<9x8x8xbf16, #tpu.memory_space<vmem>>, vector<1x8x8xbf16>
    %130 = vector.shape_cast %129 : vector<1x8x8xbf16> to vector<8x8xbf16>
    %131 = arith.truncf %128 : vector<8x128xf32> to vector<8x128xbf16>
    %cst_95 = arith.constant dense<0.000000e+00> : vector<8x128xf32>
    %132 = tpu.matmul %130, %131, %cst_95 {dimension_numbers = #tpu.dot_dimension_numbers<[1], [0], [0], [1], [0, 0, 1, 1], [], []>} : vector<8x8xbf16>, vector<8x128xbf16>, vector<8x128xf32> -> vector<8x128xf32>
    %133 = arith.addf %125, %132 : vector<8x128xf32>
    %c0_96 = arith.constant 0 : index
    %c0_97 = arith.constant 0 : index
    %c0_98 = arith.constant 0 : index
    %134 = vector.load %arg10[%c0_96, %c0_97, %c0_98] : memref<1x8x1xf32, #tpu.memory_space<vmem>>, vector<1x8x1xf32>
    %135 = vector.shape_cast %134 : vector<1x8x1xf32> to vector<8x1xf32>
    %c0_99 = arith.constant 0 : index
    %c0_100 = arith.constant 0 : index
    %c0_101 = arith.constant 0 : index
    %136 = vector.load %arg11[%c0_99, %c0_100, %c0_101] : memref<1x8x1xf32, #tpu.memory_space<vmem>>, vector<1x8x1xf32>
    %137 = vector.shape_cast %136 : vector<1x8x1xf32> to vector<8x1xf32>
    %cst_102 = arith.constant dense<0.000000e+00> : vector<8xf32>
    %138 = vector.multi_reduction <add>, %133, %cst_102 [1] : vector<8x128xf32> to vector<8xf32>
    %139 = vector.shape_cast %138 : vector<8xf32> to vector<8x1xf32>
    %cst_103 = arith.constant 7.812500e-03 : f32
    %140 = vector.broadcast %cst_103 : f32 to vector<8x1xf32>
    %141 = arith.mulf %139, %140 : vector<8x1xf32>
    %142 = arith.mulf %133, %133 : vector<8x128xf32>
    %cst_104 = arith.constant dense<0.000000e+00> : vector<8xf32>
    %143 = vector.multi_reduction <add>, %142, %cst_104 [1] : vector<8x128xf32> to vector<8xf32>
    %144 = vector.shape_cast %143 : vector<8xf32> to vector<8x1xf32>
    %cst_105 = arith.constant 7.812500e-03 : f32
    %145 = vector.broadcast %cst_105 : f32 to vector<8x1xf32>
    %146 = arith.mulf %144, %145 : vector<8x1xf32>
    %147 = arith.mulf %141, %141 : vector<8x1xf32>
    %148 = arith.subf %146, %147 : vector<8x1xf32>
    %cst_106 = arith.constant 0.000000e+00 : f32
    %149 = vector.broadcast %cst_106 : f32 to vector<8x1xf32>
    %150 = arith.maximumf %148, %149 : vector<8x1xf32>
    %cst_107 = arith.constant 9.99999974E-6 : f32
    %151 = vector.broadcast %cst_107 : f32 to vector<8x1xf32>
    %152 = arith.addf %150, %151 : vector<8x1xf32>
    %153 = math.rsqrt %152 : vector<8x1xf32>
    %154 = arith.mulf %135, %153 : vector<8x1xf32>
    %155 = vector.broadcast %154 : vector<8x1xf32> to vector<8x128xf32>
    %156 = arith.mulf %133, %155 : vector<8x128xf32>
    %157 = arith.mulf %141, %154 : vector<8x1xf32>
    %158 = arith.subf %137, %157 : vector<8x1xf32>
    %159 = vector.broadcast %158 : vector<8x1xf32> to vector<8x128xf32>
    %160 = arith.addf %156, %159 : vector<8x128xf32>
    %161 = arith.addf %160, %58 : vector<8x128xf32>
    %cst_108 = arith.constant 0.000000e+00 : f32
    %162 = vector.broadcast %cst_108 : f32 to vector<8x128xf32>
    %163 = arith.maximumf %161, %162 : vector<8x128xf32>
    %c0_109 = arith.constant 0 : index
    %c0_110 = arith.constant 0 : index
    %164 = vector.load %arg13[%c0_109, %c0_110] : memref<8x128xf32, #tpu.memory_space<vmem>>, vector<8x128xf32>
    tpu.vector_store %arg13[%c0_109, %c0_110], %163 {strides = array<i32>} : memref<8x128xf32, #tpu.memory_space<vmem>>, vector<8x128xf32>,
    return
  }
}

</mosaic_0001>

<bundles_post_ra>
// kernel: encoder_block_forward.1
= control target key start
LH: loop header
LB: loop body
LE: loop exit
PB: predicated region body
PF: predicated region fallthrough
CT: control target
= control target key end

     0   :  { %v2355_v0 = vmov 0.0   ;;  %vm2356_vm0 = vmmov 0   ;;  %vm122_vm1 = vcmask 130048   ;;  %vm69_vm2 = vcmask 392192   ;;  %s2892_s0 = inlined_call_operand.vmem [shape: bf16[48,128], index: 0, kind: input, shape index: {}]   ;;  %s2893_s2 = inlined_call_operand.vmem [shape: bf16[16,128], index: 2, kind: input, shape index: {}]   ;;  %s2894_s3 = inlined_call_operand.vmem [shape: bf16[8,16], index: 3, kind: input, shape index: {}]   ;;  %s2895_s1 = inlined_call_operand.vmem [shape: bf16[8,48], index: 1, kind: input, shape index: {}]   ;;  %s2896_s9 = inlined_call_operand.vmem [shape: bf16[9,128,128], index: 9, kind: input, shape index: {}]   ;;  %s2897_s4 = inlined_call_operand.vmem [shape: f32[8,1], index: 4, kind: input, shape index: {}]   ;;  %s2898_s6 = inlined_call_operand.vmem [shape: f32[8,1], index: 6, kind: input, shape index: {}]   ;;  %s2899_s5 = inlined_call_operand.vmem [shape: f32[8,1], index: 5, kind: input, shape index: {}]   ;;  %s2900_s7 = inlined_call_operand.vmem [shape: f32[8,1], index: 7, kind: input, shape index: {}]   ;;  %s2901_s12 = inlined_call_operand.vmem [shape: f32[8,128], index: 12, kind: output, shape index: {0}]   ;;  %s2902_s8 = inlined_call_operand.vmem [shape: bf16[9,8,8], index: 8, kind: input, shape index: {}]   ;;  %s2903_s10 = inlined_call_operand.vmem [shape: f32[1,8,1], index: 10, kind: input, shape index: {}]   ;;  %s2904_s11 = inlined_call_operand.vmem [shape: f32[1,8,1], index: 11, kind: input, shape index: {}]   ;;  %s2905_s13 = inlined_call_operand.vmem [shape: f32[8,128], index: 13, kind: output, shape index: {1}]  }
   0x1   :  { %1989 = vmatprep.subr.bf16.mxu0 %v2355_v0  ;;  %v2273_v1 = vld [vmem:[%s2892_s0] sm:$0xff]   ;;  %1999 = vmatprep.subr.bf16.mxu1 %v2355_v0  ;;  %v2274_v2 = vld [vmem:[%s2892_s0 + $0x8] sm:$0xff]   ;;  %v2275_v5 = vld [vmem:[%s2892_s0 + $0x10] sm:$0xff]   ;;  %v2357_v17 = vmov 0   ;;  %vm446_vm3 = vcmask 1043456   ;;  %vm442_vm4 = vcmask 64512  }
   0x2   :  { %1995 = vmatprep.mubr.msk.bf16.mxu0 %vm2356_vm0, %v2355_v0  ;;  %2001 = vmatprep.mubr.msk.bf16.mxu1 %vm2356_vm0, %v2355_v0  ;;  %v2276_v3 = vld [vmem:[%s2893_s2] sm:$0xff]   ;;  %v2279_v20 = vld [vmem:[%s2896_s9 + $0x8] sm:$0xff]   ;;  %v2281_v22 = vld [vmem:[%s2896_s9 + $0x10] sm:$0xff]  }
   0x3   :  { %1990 = vmatpush3.bf16.msra.mxu0 %v2273_v1  ;;  %2000 = vmatpush3.bf16.msra.mxu1 %v2276_v3  ;;  %v113_v4 = vld [vmem:[%s2894_s3] sm:$0xf]  ;;  %v2280_v21 = vld [vmem:[%s2896_s9 + $0x48] sm:$0xff]   ;;  %v2282_v23 = vld [vmem:[%s2896_s9 + $0x50] sm:$0xff]  }
   0x4   :  { %1991 = vmatprep.subr.bf16.mxu0 %v2355_v0  ;;  %2005 = vmatprep.subr.bf16.mxu1 %v2355_v0  ;;  %v44_v6 = vld [vmem:[%s2895_s1] sm:$0xf]  ;;  %v2283_v44 = vld [vmem:[%s2896_s9 + $0x18] sm:$0xff]   ;;  %v2287_v55 = vld [vmem:[%s2896_s9 + $0x28] sm:$0xff]  }
   0x5   :  { %2271 = vset.pattern.permute.xlu0 %v2357_v17  ;;  %2272 = vset.pattern.permute.xlu1 %v2357_v17  ;;  %v2277_v18 = vld [vmem:[%s2896_s9] sm:$0xff]   ;;  %v2284_v45 = vld [vmem:[%s2896_s9 + $0x58] sm:$0xff]   ;;  %v2288_v56 = vld [vmem:[%s2896_s9 + $0x68] sm:$0xff]  }
   0x6   :  { %2002 = vmatmul.mubr.msk.bf16.vlgmr.msra.gmra.mrb[0].mxu1 %vm122_vm1, %v113_v4  ;;  %v2278_v19 = vld [vmem:[%s2896_s9 + $0x40] sm:$0xff]   ;;  %v2289_v58 = vld [vmem:[%s2896_s9 + $0x30] sm:$0xff]   ;;  %v2291_v60 = vld [vmem:[%s2896_s9 + $0x38] sm:$0xff]  }
   0x7   :  { %1992 = vmatpush3.bf16.msra.mxu0 %v2274_v2  ;;  %2021 = vmatprep.mubr.msk.bf16.mxu1 %vm2356_vm0, %v2355_v0  ;;  %v166_v40 = vld [vmem:[%s2897_s4] sm:$0xff]  ;;  %v2290_v59 = vld [vmem:[%s2896_s9 + $0x70] sm:$0xff]   ;;  %v2292_v61 = vld [vmem:[%s2896_s9 + $0x78] sm:$0xff]  }
   0x8   :  { %1993 = vmatprep.subr.bf16.mxu0 %v2355_v0  ;;  %2006 = vmatpush3.bf16.msra.mxu1 %v2277_v18  ;;  %v195_v43 = vld [vmem:[%s2898_s6] sm:$0xff] }
   0x9   :  { %2007 = vmatprep.subr.bf16.mxu1 %v2355_v0  ;;  %v167_v49 = vld [vmem:[%s2899_s5] sm:$0xff] }
   0xa   :  { %v2285_v50 = vld [vmem:[%s2896_s9 + $0x20] sm:$0xff]  }
   0xb   :  { %1994 = vmatpush3.bf16.msra.mxu0 %v2275_v5  ;;  %v2286_v51 = vld [vmem:[%s2896_s9 + $0x60] sm:$0xff]  }
   0xc   :  { %2025 = vmatprep.subr.bf16.mxu0 %v2355_v0  ;;  %2008 = vmatpush3.bf16.msra.mxu1 %v2279_v20  ;;  %v196_v54 = vld [vmem:[%s2900_s7] sm:$0xff] }
   0xd   :  { %2009 = vmatprep.subr.bf16.mxu1 %v2355_v0 }
   0xe   :  { %1996 = vmatmul.mubr.msk.bf16.vlgmr.msra.gmra.mrb[0].mxu0 %vm69_vm2, %v44_v6 }
   0xf   :  { %2041 = vmatprep.mubr.msk.bf16.mxu0 %vm2356_vm0, %v2355_v0  ;;  %2026 = vmatpush3.bf16.msra.mxu0 %v2278_v19 }
  0x10   :  { %2027 = vmatprep.subr.bf16.mxu0 %v2355_v0  ;;  %2010 = vmatpush3.bf16.msra.mxu1 %v2281_v22 }
  0x11   :  { %2011 = vmatprep.subr.bf16.mxu1 %v2355_v0 }
  0x13   :  { %2028 = vmatpush3.bf16.msra.mxu0 %v2280_v21  ;;  %v1699_v21 = vld [vmem:[%s2902_s8 + $0x4] sm:$0xf] }
  0x14   :  { %2029 = vmatprep.subr.bf16.mxu0 %v2355_v0  ;;  %2012 = vmatpush3.bf16.msra.mxu1 %v2283_v44  ;;  %v2313_v44 = vld [vmem:[%s2896_s9 + $0x160] sm:$0xff]  }
  0x15   :  { %2013 = vmatprep.subr.bf16.mxu1 %v2355_v0 }
  0x17   :  { %2030 = vmatpush3.bf16.msra.mxu0 %v2282_v23  ;;  %v332_v23 = vld [vmem:[%s2902_s8] sm:$0xf] }
  0x18   :  { %2031 = vmatprep.subr.bf16.mxu0 %v2355_v0  ;;  %2014 = vmatpush3.bf16.msra.mxu1 %v2285_v50  ;;  %v2319_v50 = vld [vmem:[%s2896_s9 + $0x1d0] sm:$0xff]  }
  0x19   :  { %2015 = vmatprep.subr.bf16.mxu1 %v2355_v0 }
  0x1b   :  { %2032 = vmatpush3.bf16.msra.mxu0 %v2284_v45  ;;  %v2314_v45 = vld [vmem:[%s2896_s9 + $0x168] sm:$0xff]  }
  0x1c   :  { %2033 = vmatprep.subr.bf16.mxu0 %v2355_v0  ;;  %2016 = vmatpush3.bf16.msra.mxu1 %v2287_v55  ;;  %v2324_v55 = vld [vmem:[%s2896_s9 + $0x1f8] sm:$0xff]  }
  0x1d   :  { %2017 = vmatprep.subr.bf16.mxu1 %v2355_v0 }
  0x1f   :  { %2034 = vmatpush3.bf16.msra.mxu0 %v2286_v51  ;;  %v2320_v51 = vld [vmem:[%s2896_s9 + $0x1d8] sm:$0xff]  }
  0x20   :  { %2035 = vmatprep.subr.bf16.mxu0 %v2355_v0  ;;  %2018 = vmatpush3.bf16.msra.mxu1 %v2289_v58 }
  0x21   :  { %2019 = vmatprep.subr.bf16.mxu1 %v2355_v0 }
  0x23   :  { %2036 = vmatpush3.bf16.msra.mxu0 %v2288_v56 }
  0x24   :  { %2037 = vmatprep.subr.bf16.mxu0 %v2355_v0  ;;  %2020 = vmatpush3.bf16.msra.mxu1 %v2291_v60 }
  0x25   :  { %2077 = vmatprep.subr.bf16.mxu1 %v2355_v0 }
  0x27   :  { %2038 = vmatpush3.bf16.msra.mxu0 %v2290_v59 }
  0x28   :  { %2039 = vmatprep.subr.bf16.mxu0 %v2355_v0 }
  0x2b   :  { %2040 = vmatpush3.bf16.msra.mxu0 %v2292_v61 }
  0x2c   :  { %2045 = vmatprep.subr.bf16.mxu0 %v2355_v0 }
  0xd9   :  { %v2460_v7 = vpop.f32.mrb[0].mxu1 }
  0xda   :  { %v2003_v8 = vpop.f32.mrb[1].mxu1  ;;  %v200_v16 = vmul.f32 %v2460_v7, %v2460_v7 }
  0xdb   :  { %v163_v9 = vpop.f32.mrb[2].mxu1 }
  0xdc   :  { %v2004_v10 = vpop.f32.mrb[3].mxu1 }
  0xe1   :  { %v2462_v11 = vpop.f32.mrb[0].mxu0 }
  0xe2   :  { %168 = vadd.xlane.f32.xlu0 %v2462_v11  ;;  %v1997_v12 = vpop.f32.mrb[1].mxu0  ;;  %v171_v13 = vmul.f32 %v2462_v11, %v2462_v11 }
  0xe3   :  { %v110_v14 = vpop.f32.mrb[2].mxu0 }
  0xe4   :  { %172 = vadd.xlane.f32.xlu1 %v171_v13  ;;  %v1998_v15 = vpop.f32.mrb[3].mxu0 }
  0xe6   :  { %197 = vadd.xlane.f32.xlu0 %v2460_v7 }
  0xe8   :  { %201 = vadd.xlane.f32.xlu1 %v200_v16 }
 0x16f   :  { %v169_v24 = vpop.xlane.xlu0 %168 }
 0x170   :  { %v170_v25 = vmul.f32 0.0078125, %v169_v24  ;;  %v2293_v24 = vld [vmem:[%s2896_s9 + $0x80] sm:$0xff]  }
 0x171   :  { %v173_v26 = vpop.xlane.xlu1 %172 }
 0x172   :  { %v175_v27 = vmul.f32 %v170_v25, %v170_v25  ;;  %v174_v28 = vmul.f32 0.0078125, %v173_v26  ;;  %v2295_v26 = vld [vmem:[%s2896_s9 + $0x90] sm:$0xff]  }
 0x173   :  { %v198_v29 = vpop.xlane.xlu0 %197 }
 0x174   :  { %v176_v30 = vsub.f32 %v174_v28, %v175_v27  ;;  %v199_v31 = vmul.f32 0.0078125, %v198_v29  ;;  %v2296_v27 = vld [vmem:[%s2896_s9 + $0x98] sm:$0xff]   ;;  %v2297_v28 = vld [vmem:[%s2896_s9 + $0xa0] sm:$0xff]   ;;  %v2298_v29 = vld [vmem:[%s2896_s9 + $0xa8] sm:$0xff]  }
 0x175   :  { %v202_v32 = vpop.xlane.xlu1 %201 }
 0x176   :  { %v177_v33 = vmax.f32 %v176_v30, 0.0  ;;  %v204_v34 = vmul.f32 %v199_v31, %v199_v31  ;;  %v203_v35 = vmul.f32 0.0078125, %v202_v32  ;;  %v2299_v30 = vld [vmem:[%s2896_s9 + $0xb0] sm:$0xff]   ;;  %v2301_v32 = vld [vmem:[%s2896_s9 + $0x100] sm:$0xff]  }
 0x178   :  { %v178_v36 = vadd.f32 1e-05, %v177_v33  ;;  %v205_v37 = vsub.f32 %v203_v35, %v204_v34  ;;  %v2302_v33 = vld [vmem:[%s2896_s9 + $0x108] sm:$0xff]   ;;  %v2303_v34 = vld [vmem:[%s2896_s9 + $0x110] sm:$0xff]   ;;  %v2304_v35 = vld [vmem:[%s2896_s9 + $0x118] sm:$0xff]  }
 0x17a   :  { %2349 = vrsqrt.f32 %v178_v36  ;;  %v206_v38 = vmax.f32 %v205_v37, 0.0  ;;  %v2305_v36 = vld [vmem:[%s2896_s9 + $0x120] sm:$0xff]   ;;  %v2306_v37 = vld [vmem:[%s2896_s9 + $0x128] sm:$0xff]  }
 0x17c   :  { %v207_v39 = vadd.f32 1e-05, %v206_v38  ;;  %v2307_v38 = vld [vmem:[%s2896_s9 + $0x130] sm:$0xff]  }
 0x17e   :  { %2351 = vrsqrt.f32 %v207_v39  ;;  %v2308_v39 = vld [vmem:[%s2896_s9 + $0x138] sm:$0xff]  }
 0x184   :  { %v2350_v41 = vpop.eup %2349 }
 0x185   :  { %v180_v42 = vmul.f32 %v2350_v41, %v166_v40  ;;  %v2309_v40 = vld [vmem:[%s2896_s9 + $0x140] sm:$0xff]   ;;  %v2310_v41 = vld [vmem:[%s2896_s9 + $0x148] sm:$0xff]  }
 0x187   :  { %183 = vperm.xlu0 %2271, %v180_v42   ;;  %v187_v48 = vmul.f32 %v180_v42, %v170_v25  ;;  %v2294_v25 = vld [vmem:[%s2896_s9 + $0x88] sm:$0xff]   ;;  %v2311_v42 = vld [vmem:[%s2896_s9 + $0x150] sm:$0xff]  }
 0x188   :  { %v2352_v46 = vpop.eup %2351 }
 0x189   :  { %v209_v47 = vmul.f32 %v2352_v46, %v195_v43  ;;  %v188_v52 = vsub.f32 %v167_v49, %v187_v48  ;;  %v2312_v43 = vld [vmem:[%s2896_s9 + $0x158] sm:$0xff]   ;;  %v2315_v46 = vld [vmem:[%s2896_s9 + $0x170] sm:$0xff]   ;;  %v2317_v48 = vld [vmem:[%s2896_s9 + $0x1c0] sm:$0xff]  }
 0x18a   :  { %v2318_v49 = vld [vmem:[%s2896_s9 + $0x1c8] sm:$0xff]  }
 0x18b   :  { %212 = vperm.xlu1 %2272, %v209_v47   ;;  %v216_v53 = vmul.f32 %v209_v47, %v199_v31  ;;  %v2300_v31 = vld [vmem:[%s2896_s9 + $0xb8] sm:$0xff]  }
 0x18c   :  { %v2316_v47 = vld [vmem:[%s2896_s9 + $0x178] sm:$0xff]  }
 0x18d   :  { %v217_v57 = vsub.f32 %v196_v54, %v216_v53  ;;  %v2322_v53 = vld [vmem:[%s2896_s9 + $0x1e8] sm:$0xff]   ;;  %v2323_v54 = vld [vmem:[%s2896_s9 + $0x1f0] sm:$0xff]  }
 0x18f   :  { %191 = vperm.xlu1 %2272, %v188_v52   ;;  %v2321_v52 = vld [vmem:[%s2896_s9 + $0x1e0] sm:$0xff]  }
 0x193   :  { %220 = vperm.xlu1 %2272, %v217_v57  }
 0x206   :  { %v184_v63 = vpop.permute.xlu0 %183 }
 0x207   :  { %v186_v2 = vmul.f32 %v184_v63, %v2462_v11 }
 0x20a   :  { %v213_v62 = vpop.permute.xlu1 %212 }
 0x20b   :  { %v215_v3 = vmul.f32 %v213_v62, %v2460_v7 }
 0x20e   :  { %v192_v1 = vpop.permute.xlu1 %191 }
 0x20f   :  { %v194_v5 = vadd.f32 %v192_v1, %v186_v2 }
 0x212   :  { %v221_v4 = vpop.permute.xlu1 %220 }
 0x213   :  { %v223_v6 = vadd.f32 %v221_v4, %v215_v3  ;;  %v1726_v3 = vld [vmem:[%s2902_s8 + $0x8] sm:$0xf]  ;;  %v2325_v4 = vld [vmem:[%s2896_s9 + $0xc0] sm:$0xff]  }
 0x215   :  { %v224_v8 = vadd.f32 %v223_v6, %v194_v5  ;;  %v2326_v5 = vld [vmem:[%s2896_s9 + $0xc8] sm:$0xff]   ;;  %v2327_v6 = vld [vmem:[%s2896_s9 + $0xd0] sm:$0xff]  }
 0x217   :  { %v2548_v9 = vmax.f32 %v224_v8, 0.0  ;;  %v2328_v8 = vld [vmem:[%s2896_s9 + $0xd8] sm:$0xff]  }
 0x219   :  { %226 = vst [vmem:[%s2901_s12] sm:$0xff] %v2548_v9  ;;  %v2556_v10 = vpack.c.bf16 %v2548_v9, %v2548_v9 }
 0x21b   :  { %2022 = vmatmul.mubr.bf16.vlgmr.msra.gmra.mrb[4].mxu1 %v2556_v10  ;;  %2042 = vmatmul.mubr.bf16.vlgmr.msra.gmra.mrb[4].mxu0 %v2556_v10 }
 0x21c   :  { %2047 = vmatprep.mubr.msk.bf16.mxu0 %vm2356_vm0, %v2355_v0  ;;  %2079 = vmatprep.mubr.msk.bf16.mxu1 %vm2356_vm0, %v2355_v0 }
 0x2ee   :  { %v326_v7 = vpop.f32.mrb[4].mxu1  ;;  %v433_v11 = vpop.f32.mrb[4].mxu0 }
 0x2ef   :  { %v441_v12 = vpack.c.bf16 %v433_v11, %v433_v11  ;;  %v2023_v13 = vpop.f32.mrb[5].mxu1  ;;  %v2043_v14 = vpop.f32.mrb[5].mxu0  ;;  %v333_v17 = vpack.c.bf16 %v326_v7, %v326_v7  ;;  %v2329_v7 = vld [vmem:[%s2896_s9 + $0xe0] sm:$0xff]   ;;  %v2330_v11 = vld [vmem:[%s2896_s9 + $0xe8] sm:$0xff]  }
 0x2f0   :  { %v329_v15 = vpop.f32.mrb[6].mxu1  ;;  %v436_v16 = vpop.f32.mrb[6].mxu0  ;;  %v2332_v14 = vld [vmem:[%s2896_s9 + $0xf8] sm:$0xff]  }
 0x2f1   :  { %v448_v18 = vsel %vm446_vm3, %v441_v12, 0  ;;  %v2024_v19 = vpop.f32.mrb[7].mxu1  ;;  %v2044_v20 = vpop.f32.mrb[7].mxu0  ;;  %v494_v22 = vsel %vm446_vm3, %v333_v17, 0  ;;  %v2331_v12 = vld [vmem:[%s2896_s9 + $0xf0] sm:$0xff]  }
 0x2f2   :  { %2046 = vmatpush3.bf16.msra.mxu0 %v448_v18 }
 0x2f3   :  { %2051 = vmatprep.subr.bf16.mxu0 %v2355_v0 }
 0x2f5   :  { %2048 = vmatmul.mubr.msk.bf16.vlgmr.msra.gmra.mrb[8].mxu0 %vm442_vm4, %v1699_v21 }
 0x2f6   :  { %2052 = vmatpush3.bf16.msra.mxu0 %v494_v22  ;;  %2053 = vmatprep.mubr.msk.bf16.mxu0 %vm2356_vm0, %v2355_v0 }
 0x2f7   :  { %2057 = vmatprep.subr.bf16.mxu0 %v2355_v0 }
 0x301   :  { %2054 = vmatmul.mubr.msk.bf16.vlgmr.msra.gmra.mrb[8].mxu0 %vm442_vm4, %v332_v23 }
 0x302   :  { %2058 = vmatpush3.bf16.msra.mxu0 %v2293_v24  ;;  %2073 = vmatprep.mubr.msk.bf16.mxu0 %vm2356_vm0, %v2355_v0 }
 0x303   :  { %2059 = vmatprep.subr.bf16.mxu0 %v2355_v0 }
 0x306   :  { %2060 = vmatpush3.bf16.msra.mxu0 %v2294_v25 }
 0x307   :  { %2061 = vmatprep.subr.bf16.mxu0 %v2355_v0 }
 0x30a   :  { %2062 = vmatpush3.bf16.msra.mxu0 %v2295_v26 }
 0x30b   :  { %2063 = vmatprep.subr.bf16.mxu0 %v2355_v0 }
 0x30e   :  { %2064 = vmatpush3.bf16.msra.mxu0 %v2296_v27 }
 0x30f   :  { %2065 = vmatprep.subr.bf16.mxu0 %v2355_v0 }
 0x312   :  { %2066 = vmatpush3.bf16.msra.mxu0 %v2297_v28 }
 0x313   :  { %2067 = vmatprep.subr.bf16.mxu0 %v2355_v0 }
 0x316   :  { %2068 = vmatpush3.bf16.msra.mxu0 %v2298_v29 }
 0x317   :  { %2069 = vmatprep.subr.bf16.mxu0 %v2355_v0 }
 0x31a   :  { %2070 = vmatpush3.bf16.msra.mxu0 %v2299_v30 }
 0x31b   :  { %2071 = vmatprep.subr.bf16.mxu0 %v2355_v0 }
 0x31e   :  { %2072 = vmatpush3.bf16.msra.mxu0 %v2300_v31 }
 0x31f   :  { %2109 = vmatprep.subr.bf16.mxu0 %v2355_v0 }
 0x321   :  { %2074 = vmatmul.mubr.bf16.vlgmr.msra.gmra.mrb[12].mxu0 %v2556_v10 }
 0x322   :  { %2110 = vmatpush3.bf16.msra.mxu0 %v2301_v32  ;;  %2125 = vmatprep.mubr.msk.bf16.mxu0 %vm2356_vm0, %v2355_v0 }
 0x323   :  { %2111 = vmatprep.subr.bf16.mxu0 %v2355_v0 }
 0x326   :  { %2112 = vmatpush3.bf16.msra.mxu0 %v2302_v33  ;;  %v1752_v33 = vld [vmem:[%s2902_s8 + $0xc] sm:$0xf] }
 0x327   :  { %2113 = vmatprep.subr.bf16.mxu0 %v2355_v0 }
 0x32a   :  { %2114 = vmatpush3.bf16.msra.mxu0 %v2303_v34 }
 0x32b   :  { %2115 = vmatprep.subr.bf16.mxu0 %v2355_v0 }
 0x32e   :  { %2116 = vmatpush3.bf16.msra.mxu0 %v2304_v35 }
 0x32f   :  { %2117 = vmatprep.subr.bf16.mxu0 %v2355_v0 }
 0x332   :  { %2118 = vmatpush3.bf16.msra.mxu0 %v2305_v36  ;;  %v1778_v36 = vld [vmem:[%s2902_s8 + $0x10] sm:$0xf] }
 0x333   :  { %2119 = vmatprep.subr.bf16.mxu0 %v2355_v0 }
 0x336   :  { %2120 = vmatpush3.bf16.msra.mxu0 %v2306_v37 }
 0x337   :  { %2121 = vmatprep.subr.bf16.mxu0 %v2355_v0 }
 0x33a   :  { %2122 = vmatpush3.bf16.msra.mxu0 %v2307_v38  ;;  %v1804_v38 = vld [vmem:[%s2902_s8 + $0x14] sm:$0xf] }
 0x33b   :  { %2123 = vmatprep.subr.bf16.mxu0 %v2355_v0 }
 0x33e   :  { %2124 = vmatpush3.bf16.msra.mxu0 %v2308_v39  ;;  %v2333_v39 = vld [vmem:[%s2896_s9 + $0x180] sm:$0xff]  }
 0x33f   :  { %2135 = vmatprep.subr.bf16.mxu0 %v2355_v0 }
 0x341   :  { %2126 = vmatmul.mubr.bf16.vlgmr.msra.gmra.mrb[16].mxu0 %v2556_v10 }
 0x342   :  { %2136 = vmatpush3.bf16.msra.mxu0 %v2309_v40  ;;  %2151 = vmatprep.mubr.msk.bf16.mxu0 %vm2356_vm0, %v2355_v0  ;;  %v2334_v40 = vld [vmem:[%s2896_s9 + $0x188] sm:$0xff]  }
 0x343   :  { %2137 = vmatprep.subr.bf16.mxu0 %v2355_v0 }
 0x346   :  { %2138 = vmatpush3.bf16.msra.mxu0 %v2310_v41  ;;  %v2335_v41 = vld [vmem:[%s2896_s9 + $0x190] sm:$0xff]  }
 0x347   :  { %2139 = vmatprep.subr.bf16.mxu0 %v2355_v0 }
 0x34a   :  { %2140 = vmatpush3.bf16.msra.mxu0 %v2311_v42  ;;  %v2336_v42 = vld [vmem:[%s2896_s9 + $0x198] sm:$0xff]  }
 0x34b   :  { %2141 = vmatprep.subr.bf16.mxu0 %v2355_v0 }
 0x34e   :  { %2142 = vmatpush3.bf16.msra.mxu0 %v2312_v43  ;;  %v2337_v43 = vld [vmem:[%s2896_s9 + $0x1a0] sm:$0xff]  }
 0x34f   :  { %2143 = vmatprep.subr.bf16.mxu0 %v2355_v0 }
 0x352   :  { %2144 = vmatpush3.bf16.msra.mxu0 %v2313_v44  ;;  %v2338_v44 = vld [vmem:[%s2896_s9 + $0x1a8] sm:$0xff]  }
 0x353   :  { %2145 = vmatprep.subr.bf16.mxu0 %v2355_v0 }
 0x356   :  { %2146 = vmatpush3.bf16.msra.mxu0 %v2314_v45  ;;  %v2339_v45 = vld [vmem:[%s2896_s9 + $0x1b0] sm:$0xff]  }
 0x357   :  { %2147 = vmatprep.subr.bf16.mxu0 %v2355_v0 }
 0x35a   :  { %2148 = vmatpush3.bf16.msra.mxu0 %v2315_v46  ;;  %v2340_v46 = vld [vmem:[%s2896_s9 + $0x1b8] sm:$0xff]  }
 0x35b   :  { %2149 = vmatprep.subr.bf16.mxu0 %v2355_v0 }
 0x35e   :  { %2150 = vmatpush3.bf16.msra.mxu0 %v2316_v47 }
 0x35f   :  { %2187 = vmatprep.subr.bf16.mxu0 %v2355_v0 }
 0x361   :  { %2152 = vmatmul.mubr.bf16.vlgmr.msra.gmra.mrb[20].mxu0 %v2556_v10 }
 0x362   :  { %2188 = vmatpush3.bf16.msra.mxu0 %v2317_v48  ;;  %2203 = vmatprep.mubr.msk.bf16.mxu0 %vm2356_vm0, %v2355_v0 }
 0x363   :  { %2189 = vmatprep.subr.bf16.mxu0 %v2355_v0 }
 0x366   :  { %2190 = vmatpush3.bf16.msra.mxu0 %v2318_v49 }
 0x367   :  { %2191 = vmatprep.subr.bf16.mxu0 %v2355_v0 }
 0x36a   :  { %2192 = vmatpush3.bf16.msra.mxu0 %v2319_v50 }
 0x36b   :  { %2193 = vmatprep.subr.bf16.mxu0 %v2355_v0 }
 0x36e   :  { %2194 = vmatpush3.bf16.msra.mxu0 %v2320_v51 }
 0x36f   :  { %2195 = vmatprep.subr.bf16.mxu0 %v2355_v0 }
 0x372   :  { %2196 = vmatpush3.bf16.msra.mxu0 %v2321_v52 }
 0x373   :  { %2197 = vmatprep.subr.bf16.mxu0 %v2355_v0 }
 0x376   :  { %2198 = vmatpush3.bf16.msra.mxu0 %v2322_v53 }
 0x377   :  { %2199 = vmatprep.subr.bf16.mxu0 %v2355_v0 }
 0x37a   :  { %2200 = vmatpush3.bf16.msra.mxu0 %v2323_v54  ;;  %v1830_v54 = vld [vmem:[%s2902_s8 + $0x18] sm:$0xf] }
 0x37b   :  { %2201 = vmatprep.subr.bf16.mxu0 %v2355_v0 }
 0x37e   :  { %2202 = vmatpush3.bf16.msra.mxu0 %v2324_v55 }
 0x381   :  { %2204 = vmatmul.mubr.bf16.vlgmr.msra.gmra.mrb[24].mxu0 %v2556_v10 }
 0x3d4   :  { %v2717_v56 = vpop.f32.mrb[8].mxu0 }
 0x3d5   :  { %v2055_v57 = vpop.f32.mrb[9].mxu0 }
 0x3d6   :  { %v533_v58 = vpop.f32.mrb[10].mxu0  ;;  %v1856_v57 = vld [vmem:[%s2902_s8 + $0x1c] sm:$0xf] }
 0x3d7   :  { %v2056_v59 = vpop.f32.mrb[11].mxu0  ;;  %v2341_v58 = vld [vmem:[%s2896_s9 + $0x200] sm:$0xff]  }
 0x3d8   :  { %v2342_v59 = vld [vmem:[%s2896_s9 + $0x208] sm:$0xff]  }
 0x3f4   :  { %v635_v60 = vpop.f32.mrb[12].mxu0 }
 0x3f5   :  { %v643_v61 = vpack.c.bf16 %v635_v60, %v635_v60  ;;  %v2075_v62 = vpop.f32.mrb[13].mxu0  ;;  %v2343_v60 = vld [vmem:[%s2896_s9 + $0x210] sm:$0xff]  }
 0x3f6   :  { %v638_v63 = vpop.f32.mrb[14].mxu0  ;;  %v2345_v62 = vld [vmem:[%s2896_s9 + $0x220] sm:$0xff]  }
 0x3f7   :  { %v648_v1 = vsel %vm446_vm3, %v643_v61, 0  ;;  %v2076_v2 = vpop.f32.mrb[15].mxu0  ;;  %v2344_v61 = vld [vmem:[%s2896_s9 + $0x218] sm:$0xff]   ;;  %v2346_v63 = vld [vmem:[%s2896_s9 + $0x228] sm:$0xff]  }
 0x3f8   :  { %2078 = vmatpush3.bf16.msra.mxu1 %v648_v1  ;;  %v2347_v1 = vld [vmem:[%s2896_s9 + $0x230] sm:$0xff]   ;;  %v2348_v2 = vld [vmem:[%s2896_s9 + $0x238] sm:$0xff]  }
 0x3f9   :  { %2083 = vmatprep.subr.bf16.mxu1 %v2355_v0 }
 0x3fb   :  { %2080 = vmatmul.mubr.msk.bf16.vlgmr.msra.gmra.mrb[8].mxu1 %vm442_vm4, %v1726_v3 }
 0x3fc   :  { %2084 = vmatpush3.bf16.msra.mxu1 %v2325_v4  ;;  %2099 = vmatprep.mubr.msk.bf16.mxu1 %vm2356_vm0, %v2355_v0 }
 0x3fd   :  { %2085 = vmatprep.subr.bf16.mxu1 %v2355_v0 }
 0x400   :  { %2086 = vmatpush3.bf16.msra.mxu1 %v2326_v5 }
 0x401   :  { %2087 = vmatprep.subr.bf16.mxu1 %v2355_v0 }
 0x404   :  { %2088 = vmatpush3.bf16.msra.mxu1 %v2327_v6 }
 0x405   :  { %2089 = vmatprep.subr.bf16.mxu1 %v2355_v0 }
 0x408   :  { %2090 = vmatpush3.bf16.msra.mxu1 %v2328_v8 }
 0x409   :  { %2091 = vmatprep.subr.bf16.mxu1 %v2355_v0 }
 0x40c   :  { %2092 = vmatpush3.bf16.msra.mxu1 %v2329_v7 }
 0x40d   :  { %2093 = vmatprep.subr.bf16.mxu1 %v2355_v0 }
 0x410   :  { %2094 = vmatpush3.bf16.msra.mxu1 %v2330_v11  ;;  %v1882_v11 = vld [vmem:[%s2902_s8 + $0x20] sm:$0xf] }
 0x411   :  { %2095 = vmatprep.subr.bf16.mxu1 %v2355_v0 }
 0x414   :  { %2096 = vmatpush3.bf16.msra.mxu1 %v2331_v12  ;;  %v945_v13 = vpop.f32.mrb[16].mxu0 }
 0x415   :  { %v2127_v15 = vpop.f32.mrb[17].mxu0  ;;  %2097 = vmatprep.subr.bf16.mxu1 %v2355_v0  ;;  %v953_v30 = vpack.c.bf16 %v945_v13, %v945_v13 }
 0x416   :  { %v948_v16 = vpop.f32.mrb[18].mxu0 }
 0x417   :  { %v2128_v17 = vpop.f32.mrb[19].mxu0  ;;  %v958_v34 = vsel %vm446_vm3, %v953_v30, 0 }
 0x418   :  { %2098 = vmatpush3.bf16.msra.mxu1 %v2332_v14 }
 0x419   :  { %2103 = vmatprep.subr.bf16.mxu1 %v2355_v0 }
 0x41b   :  { %2100 = vmatmul.mubr.bf16.vlgmr.msra.gmra.mrb[12].mxu1 %v2556_v10 }
 0x41c   :  { %2105 = vmatprep.mubr.msk.bf16.mxu1 %vm2356_vm0, %v2355_v0 }
 0x434   :  { %v1100_v18 = vpop.f32.mrb[20].mxu0 }
 0x435   :  { %v2153_v19 = vpop.f32.mrb[21].mxu0  ;;  %v1108_v35 = vpack.c.bf16 %v1100_v18, %v1100_v18 }
 0x436   :  { %v1103_v20 = vpop.f32.mrb[22].mxu0 }
 0x437   :  { %v2154_v21 = vpop.f32.mrb[23].mxu0  ;;  %v1113_v37 = vsel %vm446_vm3, %v1108_v35, 0 }
 0x454   :  { %v2762_v22 = vpop.f32.mrb[24].mxu0 }
 0x455   :  { %v2205_v23 = vpop.f32.mrb[25].mxu0  ;;  %v1418_v51 = vpack.c.bf16 %v2762_v22, %v2762_v22 }
 0x456   :  { %v1413_v24 = vpop.f32.mrb[26].mxu0 }
 0x457   :  { %v2206_v25 = vpop.f32.mrb[27].mxu0  ;;  %v1423_v55 = vsel %vm446_vm3, %v1418_v51, 0  ;;  %v1621_v24 = vld [vmem:[%s2903_s10] sm:$0xff] }
 0x4ee   :  { %v790_v26 = vpop.f32.mrb[12].mxu1 }
 0x4ef   :  { %v798_v27 = vpack.c.bf16 %v790_v26, %v790_v26  ;;  %v2101_v28 = vpop.f32.mrb[13].mxu1  ;;  %v1622_v26 = vld [vmem:[%s2904_s11] sm:$0xff] }
 0x4f0   :  { %v793_v29 = vpop.f32.mrb[14].mxu1 }
 0x4f1   :  { %v803_v31 = vsel %vm446_vm3, %v798_v27, 0  ;;  %v2102_v32 = vpop.f32.mrb[15].mxu1 }
 0x4f2   :  { %2104 = vmatpush3.bf16.msra.mxu1 %v803_v31 }
 0x4f3   :  { %2129 = vmatprep.subr.bf16.mxu1 %v2355_v0 }
 0x4f5   :  { %2106 = vmatmul.mubr.msk.bf16.vlgmr.msra.gmra.mrb[8].mxu1 %vm442_vm4, %v1752_v33 }
 0x4f6   :  { %2130 = vmatpush3.bf16.msra.mxu1 %v958_v34  ;;  %2131 = vmatprep.mubr.msk.bf16.mxu1 %vm2356_vm0, %v2355_v0 }
 0x4f7   :  { %2155 = vmatprep.subr.bf16.mxu1 %v2355_v0 }
 0x501   :  { %2132 = vmatmul.mubr.msk.bf16.vlgmr.msra.gmra.mrb[8].mxu1 %vm442_vm4, %v1778_v36 }
 0x502   :  { %2156 = vmatpush3.bf16.msra.mxu1 %v1113_v37  ;;  %2157 = vmatprep.mubr.msk.bf16.mxu1 %vm2356_vm0, %v2355_v0 }
 0x503   :  { %2161 = vmatprep.subr.bf16.mxu1 %v2355_v0 }
 0x50d   :  { %2158 = vmatmul.mubr.msk.bf16.vlgmr.msra.gmra.mrb[8].mxu1 %vm442_vm4, %v1804_v38 }
 0x50e   :  { %2162 = vmatpush3.bf16.msra.mxu1 %v2333_v39  ;;  %2177 = vmatprep.mubr.msk.bf16.mxu1 %vm2356_vm0, %v2355_v0 }
 0x50f   :  { %2163 = vmatprep.subr.bf16.mxu1 %v2355_v0 }
 0x512   :  { %2164 = vmatpush3.bf16.msra.mxu1 %v2334_v40 }
 0x513   :  { %2165 = vmatprep.subr.bf16.mxu1 %v2355_v0 }
 0x516   :  { %2166 = vmatpush3.bf16.msra.mxu1 %v2335_v41 }
 0x517   :  { %2167 = vmatprep.subr.bf16.mxu1 %v2355_v0 }
 0x51a   :  { %2168 = vmatpush3.bf16.msra.mxu1 %v2336_v42 }
 0x51b   :  { %2169 = vmatprep.subr.bf16.mxu1 %v2355_v0 }
 0x51e   :  { %2170 = vmatpush3.bf16.msra.mxu1 %v2337_v43 }
 0x51f   :  { %2171 = vmatprep.subr.bf16.mxu1 %v2355_v0 }
 0x522   :  { %2172 = vmatpush3.bf16.msra.mxu1 %v2338_v44 }
 0x523   :  { %2173 = vmatprep.subr.bf16.mxu1 %v2355_v0 }
 0x526   :  { %2174 = vmatpush3.bf16.msra.mxu1 %v2339_v45 }
 0x527   :  { %2175 = vmatprep.subr.bf16.mxu1 %v2355_v0 }
 0x52a   :  { %2176 = vmatpush3.bf16.msra.mxu1 %v2340_v46 }
 0x52b   :  { %2181 = vmatprep.subr.bf16.mxu1 %v2355_v0 }
 0x52d   :  { %2178 = vmatmul.mubr.bf16.vlgmr.msra.gmra.mrb[16].mxu1 %v2556_v10 }
 0x52e   :  { %2183 = vmatprep.mubr.msk.bf16.mxu1 %vm2356_vm0, %v2355_v0 }
 0x600   :  { %v1255_v47 = vpop.f32.mrb[16].mxu1 }
 0x601   :  { %v1263_v48 = vpack.c.bf16 %v1255_v47, %v1255_v47  ;;  %v2179_v49 = vpop.f32.mrb[17].mxu1 }
 0x602   :  { %v1258_v50 = vpop.f32.mrb[18].mxu1 }
 0x603   :  { %v1268_v52 = vsel %vm446_vm3, %v1263_v48, 0  ;;  %v2180_v53 = vpop.f32.mrb[19].mxu1 }
 0x604   :  { %2182 = vmatpush3.bf16.msra.mxu1 %v1268_v52 }
 0x605   :  { %2207 = vmatprep.subr.bf16.mxu1 %v2355_v0 }
 0x607   :  { %2184 = vmatmul.mubr.msk.bf16.vlgmr.msra.gmra.mrb[8].mxu1 %vm442_vm4, %v1830_v54 }
 0x608   :  { %2208 = vmatpush3.bf16.msra.mxu1 %v1423_v55  ;;  %2209 = vmatprep.mubr.msk.bf16.mxu1 %vm2356_vm0, %v2355_v0 }
 0x609   :  { %2213 = vmatprep.subr.bf16.mxu1 %v2355_v0 }
 0x613   :  { %2210 = vmatmul.mubr.msk.bf16.vlgmr.msra.gmra.mrb[8].mxu1 %vm442_vm4, %v1856_v57 }
 0x614   :  { %2214 = vmatpush3.bf16.msra.mxu1 %v2341_v58  ;;  %2229 = vmatprep.mubr.msk.bf16.mxu1 %vm2356_vm0, %v2355_v0 }
 0x615   :  { %2215 = vmatprep.subr.bf16.mxu1 %v2355_v0 }
 0x618   :  { %2216 = vmatpush3.bf16.msra.mxu1 %v2342_v59 }
 0x619   :  { %2217 = vmatprep.subr.bf16.mxu1 %v2355_v0 }
 0x61c   :  { %2218 = vmatpush3.bf16.msra.mxu1 %v2343_v60 }
 0x61d   :  { %2219 = vmatprep.subr.bf16.mxu1 %v2355_v0 }
 0x620   :  { %2220 = vmatpush3.bf16.msra.mxu1 %v2344_v61 }
 0x621   :  { %2221 = vmatprep.subr.bf16.mxu1 %v2355_v0 }
 0x624   :  { %2222 = vmatpush3.bf16.msra.mxu1 %v2345_v62 }
 0x625   :  { %2223 = vmatprep.subr.bf16.mxu1 %v2355_v0 }
 0x628   :  { %2224 = vmatpush3.bf16.msra.mxu1 %v2346_v63 }
 0x629   :  { %2225 = vmatprep.subr.bf16.mxu1 %v2355_v0 }
 0x62c   :  { %2226 = vmatpush3.bf16.msra.mxu1 %v2347_v1 }
 0x62d   :  { %2227 = vmatprep.subr.bf16.mxu1 %v2355_v0 }
 0x630   :  { %2228 = vmatpush3.bf16.msra.mxu1 %v2348_v2 }
 0x631   :  { %2233 = vmatprep.subr.bf16.mxu1 %v2355_v0 }
 0x633   :  { %2230 = vmatmul.mubr.bf16.vlgmr.msra.gmra.mrb[20].mxu1 %v2556_v10 }
 0x634   :  { %2235 = vmatprep.mubr.msk.bf16.mxu1 %vm2356_vm0, %v2355_v0 }
 0x706   :  { %v1565_v3 = vpop.f32.mrb[20].mxu1 }
 0x707   :  { %v1573_v4 = vpack.c.bf16 %v1565_v3, %v1565_v3  ;;  %v2231_v5 = vpop.f32.mrb[21].mxu1 }
 0x708   :  { %v1568_v6 = vpop.f32.mrb[22].mxu1 }
 0x709   :  { %v1578_v8 = vsel %vm446_vm3, %v1573_v4, 0  ;;  %v2232_v7 = vpop.f32.mrb[23].mxu1 }
 0x70a   :  { %2234 = vmatpush3.bf16.msra.mxu1 %v1578_v8 }
 0x70d   :  { %2236 = vmatmul.mubr.msk.bf16.vlgmr.msra.gmra.mrb[8].mxu1 %vm442_vm4, %v1882_v11 }
 0x7e0   :  { %v1614_v12 = vpop.f32.mrb[8].mxu1 }
 0x7e1   :  { %v2239_v10 = vadd.f32 %v1614_v12, %v2717_v56  ;;  %v2237_v13 = vpop.f32.mrb[9].mxu1 }
 0x7e2   :  { %v1617_v14 = vpop.f32.mrb[10].mxu1 }
 0x7e3   :  { %1623 = vadd.xlane.f32.xlu1 %v2239_v10  ;;  %v2238_v0 = vpop.f32.mrb[11].mxu1  ;;  %v1626_v15 = vmul.f32 %v2239_v10, %v2239_v10 }
 0x7e5   :  { %1627 = vadd.xlane.f32.xlu0 %v1626_v15 }
 0x870   :  { %v1624_v16 = vpop.xlane.xlu1 %1623 }
 0x871   :  { %v1625_v17 = vmul.f32 0.0078125, %v1624_v16 }
 0x872   :  { %v1628_v18 = vpop.xlane.xlu0 %1627 }
 0x873   :  { %v1630_v19 = vmul.f32 %v1625_v17, %v1625_v17  ;;  %v1629_v20 = vmul.f32 0.0078125, %v1628_v18 }
 0x875   :  { %v1631_v21 = vsub.f32 %v1629_v20, %v1630_v19 }
 0x877   :  { %v1632_v22 = vmax.f32 %v1631_v21, 0.0 }
 0x879   :  { %v1633_v23 = vadd.f32 1e-05, %v1632_v22 }
 0x87b   :  { %2353 = vrsqrt.f32 %v1633_v23 }
 0x885   :  { %v2354_v56 = vpop.eup %2353 }
 0x886   :  { %v1635_v25 = vmul.f32 %v2354_v56, %v1621_v24 }
 0x888   :  { %1638 = vperm.xlu1 %2272, %v1635_v25   ;;  %v1642_v27 = vmul.f32 %v1635_v25, %v1625_v17 }
 0x88a   :  { %v1643_v28 = vsub.f32 %v1622_v26, %v1642_v27 }
 0x88c   :  { %1646 = vperm.xlu0 %2271, %v1643_v28  }
 0x907   :  { %v1639_v29 = vpop.permute.xlu1 %1638 }
 0x908   :  { %v1641_v30 = vmul.f32 %v2239_v10, %v1639_v29 }
 0x90b   :  { %v1647_v31 = vpop.permute.xlu0 %1646 }
 0x90c   :  { %v1649_v32 = vadd.f32 %v1647_v31, %v1641_v30 }
 0x90e   :  { %v1650_v33 = vadd.f32 %v1649_v32, %v2548_v9 }
 0x910   :  { %v1651_v34 = vmax.f32 %v1650_v33, 0.0 }
 0x912   :  { %1652 = vst [vmem:[%s2905_s13] sm:$0xff] %v1651_v34 }

</bundles_post_ra>
